<compile_context>
chip_gen: v7x
topology: tpu7x:2x2x1
jax: 0.10.0
libtpu: 0.0.40
codegen_flags: <defaults>
</compile_context>

<pallas_src>
import jax
import jax.numpy as jnp
from jax.experimental import pallas as pl
from jax.experimental.pallas import tpu as pltpu

W_NORMAL = 1.0   # weights[0] of the module's default weights=[1, 0.5]
W_AUX = 0.5      # weights[1]


def _round_up(x, m):
    return ((x + m - 1) // m) * m


def _make_kernel(rem):
    """Build the kernel. `rem` = T % t_tile (0 => every time tile is full)."""

    def kernel(logit_ref, target_ref, frame_ref, out_ref, max_sc):
        # Grid = (B, num_t). frame_ref block is (1, t_tile, C) in native (B, T, C) layout.
        t = pl.program_id(1)
        last_t = pl.num_programs(1) - 1

        @pl.when(t == 0)
        def _init():
            # -inf identity: correct even if framewise values are unnormalized/negative.
            max_sc[...] = jnp.full_like(max_sc, -jnp.inf)

        def _reduce(valid_rows):
            frame = frame_ref[...]                                  # (1, t_tile, C), native dtype
            if valid_rows is not None:
                # Mask the unspecified tail of the last (partial) time tile.
                tidx = jax.lax.broadcasted_iota(jnp.int32, frame.shape, 1)
                frame = jnp.where(tidx < valid_rows, frame,
                                  jnp.array(-jnp.inf, dtype=frame.dtype))
            # Sublane (time) reduction in native dtype (max is exact); cast only the
            # tiny reduced result to f32 -- keeps per-element VALU work minimal (v5e).
            tile_max = jnp.max(frame, axis=1).astype(jnp.float32)   # (1, C)
            max_sc[...] = jnp.maximum(max_sc[...], tile_max)

        if rem == 0:
            _reduce(None)
        else:
            @pl.when(t < last_t)
            def _full_tile():
                _reduce(None)

            @pl.when(t == last_t)
            def _partial_tile():
                _reduce(rem)

        @pl.when(t == last_t)
        def _finalize():
            x = logit_ref[0].astype(jnp.float32)      # (1, C) logits
            y = target_ref[0].astype(jnp.float32)     # (1, C) targets (target.float())
            p = max_sc[...]                           # (1, C) clip-wise max

            # BCEWithLogitsLoss, numerically-stable form used by PyTorch:
            #   max(x, 0) - x*y + log(1 + exp(-|x|))
            bce_logits = jnp.maximum(x, 0.0) - x * y + jnp.log1p(jnp.exp(-jnp.abs(x)))

            # BCELoss with PyTorch's log clamp at -100 (handles p == 0 or p == 1).
            log_p = jnp.maximum(jnp.log(p), -100.0)
            log_1mp = jnp.maximum(jnp.log(1.0 - p), -100.0)
            bce = -(y * log_p + (1.0 - y) * log_1mp)

            # Per-batch-row partial weighted sum; wrapper divides by the true B*C.
            partial = W_NORMAL * jnp.sum(bce_logits) + W_AUX * jnp.sum(bce)
            out_ref[...] = jnp.reshape(partial, (1, 1, 1))

    return kernel


def improved_panns_loss(logit, framewise_output, target, *, t_tile=None):
    """logit: (B, C) float, framewise_output: (B, T, C) float, target: (B, C)."""
    B, C = logit.shape
    Bf, T, Cf = framewise_output.shape
    assert Bf == B and Cf == C, "shape mismatch between logit and framewise_output"

    itemsize = jnp.dtype(framewise_output.dtype).itemsize
    lanes = _round_up(C, 128)          # lane-padded class width in VMEM

    # Auto-pick t_tile so each frame block is ~4 MiB in VMEM (lane-padded);
    # double-buffered that's ~8 MiB -- safe on v5e/v6e (128 MiB) and v7x (64 MiB).
    if t_tile is None:
        target_block_bytes = 4 << 20
        t_tile = max(8, (target_block_bytes // (lanes * itemsize)) // 8 * 8)
    if t_tile >= T:
        t_tile = T                     # whole time row per batch step, single tile
    else:
        t_tile = max(8, (t_tile // 8) * 8)   # sublane-aligned when tiling

    num_t = pl.cdiv(T, t_tile)
    rem = T % t_tile                   # 0 => no in-kernel masking needed

    logit3 = logit.reshape(B, 1, C)
    target3 = target.reshape(B, 1, C)

    block_bytes = _round_up(t_tile, 8) * lanes * itemsize
    vmem_limit = int(min(max(2 * block_bytes + (8 << 20), 32 << 20), 48 << 20))

    cost = pl.CostEstimate(
        flops=int(B * T * C + 12 * B * C),           # max reduction + BCE epilogue
        transcendentals=int(4 * B * C),              # exp, log1p, 2x log per (b, c)
        bytes_accessed=int(framewise_output.size * itemsize
                           + logit.size * jnp.dtype(logit.dtype).itemsize
                           + target.size * jnp.dtype(target.dtype).itemsize
                           + B * 4),
    )

    partials = pl.pallas_call(
        _make_kernel(rem),
        out_shape=jax.ShapeDtypeStruct((B, 1, 1), jnp.float32),
        grid_spec=pltpu.PrefetchScalarGridSpec(
            num_scalar_prefetch=0,
            grid=(B, num_t),
            in_specs=[
                pl.BlockSpec((1, 1, C), lambda b, t: (b, 0, 0)),        # logit row
                pl.BlockSpec((1, 1, C), lambda b, t: (b, 0, 0)),        # target row
                pl.BlockSpec((1, t_tile, C), lambda b, t: (b, t, 0)),   # framewise tile (native layout)
            ],
            out_specs=pl.BlockSpec((1, 1, 1), lambda b, t: (b, 0, 0)),
            scratch_shapes=[pltpu.VMEM((1, C), jnp.float32)],           # running max
        ),
        compiler_params=pltpu.CompilerParams(
            dimension_semantics=("parallel", "arbitrary"),
            vmem_limit_bytes=vmem_limit,
        ),
        cost_estimate=cost,
    )(logit3, target3, framewise_output)

    # Finish the means (divide by the TRUE B*C) and the cross-batch sum.
    return jnp.sum(partials) / (B * C)


def _reference(logit, framewise_output, target):
    # Pure-JAX reference mirroring the PyTorch module.
    x = logit.astype(jnp.float32)
    t = target.astype(jnp.float32)
    bce_logits = jnp.maximum(x, 0.0) - x * t + jnp.log1p(jnp.exp(-jnp.abs(x)))
    normal_loss = jnp.mean(bce_logits)
    p = jnp.max(framewise_output.astype(jnp.float32), axis=1)
    bce = -(t * jnp.maximum(jnp.log(p), -100.0)
            + (1.0 - t) * jnp.maximum(jnp.log(1.0 - p), -100.0))
    aux_loss = jnp.mean(bce)
    return W_NORMAL * normal_loss + W_AUX * aux_loss


if __name__ == "__main__":
    key = jax.random.PRNGKey(0)

    # Case 1: tiny shapes, whole time row per batch step (single tile), f32.
    B, T, C = 2, 8, 16
    k1, k2, k3, key = jax.random.split(key, 4)
    logit = jax.random.normal(k1, (B, C), dtype=jnp.float32)
    framewise = jax.nn.sigmoid(jax.random.normal(k2, (B, T, C), dtype=jnp.float32))
    target = (jax.random.uniform(k3, (B, C)) > 0.5).astype(jnp.float32)

    loss = improved_panns_loss(logit, framewise, target)
    jax.block_until_ready(loss)
    ref = _reference(logit, framewise, target)
    assert jnp.allclose(loss, ref, rtol=1e-5, atol=1e-5), (loss, ref)

    # Case 2: bf16 streaming, multiple time tiles with a PARTIAL last tile
    # (exercises the running-max accumulator and in-kernel masking, T=300, tile=128).
    B, T, C = 2, 300, 24
    k1, k2, k3, key = jax.random.split(key, 4)
    logit = jax.random.normal(k1, (B, C), dtype=jnp.float32)
    framewise = jax.nn.sigmoid(
        jax.random.normal(k2, (B, T, C), dtype=jnp.float32)).astype(jnp.bfloat16)
    target = (jax.random.uniform(k3, (B, C)) > 0.5).astype(jnp.float32)

    loss = improved_panns_loss(logit, framewise, target, t_tile=128)
    jax.block_until_ready(loss)
    ref = _reference(logit, framewise, target)
    assert jnp.allclose(loss, ref, rtol=1e-4, atol=1e-4), (loss, ref)

    # Case 3: f32, multiple FULL time tiles (no masking path), explicit tile.
    B, T, C = 2, 512, 24
    k1, k2, k3, key = jax.random.split(key, 4)
    logit = jax.random.normal(k1, (B, C), dtype=jnp.float32)
    framewise = jax.nn.sigmoid(jax.random.normal(k2, (B, T, C), dtype=jnp.float32))
    target = (jax.random.uniform(k3, (B, C)) > 0.5).astype(jnp.float32)

    loss = improved_panns_loss(logit, framewise, target, t_tile=256)
    jax.block_until_ready(loss)
    ref = _reference(logit, framewise, target)
    assert jnp.allclose(loss, ref, rtol=1e-5, atol=1e-5), (loss, ref)

    print("KERNEL_OK")
</pallas_src>

<mosaic_0001>
module attributes {stable_mosaic.version = 11 : i64} {
  func.func @kernel(%arg0: i32, %arg1: i32, %arg2: memref<1x1x16xf32, #tpu.memory_space<vmem>>, %arg3: memref<1x1x16xf32, #tpu.memory_space<vmem>>, %arg4: memref<1x8x16xf32, #tpu.memory_space<vmem>>, %arg5: memref<1x1x1xf32, #tpu.memory_space<vmem>>, %arg6: memref<1x16xf32, #tpu.memory_space<vmem>>) attributes {dimension_semantics = [#tpu.dimension_semantics<parallel>, #tpu.dimension_semantics<arbitrary>], iteration_bounds = array<i64: 2, 1>, scalar_prefetch = 0 : i64, scratch_operands = 1 : i64, tpu.core_type = #tpu.core_type<tc>, window_params = [{transform_indices = @transform_0, window_bounds = array<i64: 1, 1, 16>}, {transform_indices = @transform_1, window_bounds = array<i64: 1, 1, 16>}, {transform_indices = @transform_2, window_bounds = array<i64: 1, 8, 16>}, {transform_indices = @transform_3, window_bounds = array<i64: 1, 1, 1>}]} {
    %c0_i32 = arith.constant 0 : i32
    %0 = arith.cmpi eq, %arg1, %c0_i32 : i32
    %1 = arith.extui %0 : i1 to i32
    %c0_i32_0 = arith.constant 0 : i32
    %2 = arith.cmpi ne, %1, %c0_i32_0 : i32
    scf.if %2 {
      %cst_9 = arith.constant 0xFF800000 : f32
      %11 = vector.broadcast %cst_9 : f32 to vector<1x16xf32>
      %c0_10 = arith.constant 0 : index
      %c0_11 = arith.constant 0 : index
      %12 = vector.load %arg6[%c0_10, %c0_11] : memref<1x16xf32, #tpu.memory_space<vmem>>, vector<1x16xf32>
      tpu.vector_store %arg6[%c0_10, %c0_11], %11 {strides = array<i32>} : memref<1x16xf32, #tpu.memory_space<vmem>>, vector<1x16xf32>,
    } else {
    }
    %c0 = arith.constant 0 : index
    %c0_1 = arith.constant 0 : index
    %c0_2 = arith.constant 0 : index
    %3 = vector.load %arg4[%c0, %c0_1, %c0_2] : memref<1x8x16xf32, #tpu.memory_space<vmem>>, vector<1x8x16xf32>
    %cst = arith.constant dense<0xFF800000> : vector<1x16xf32>
    %4 = vector.multi_reduction <maximumf>, %3, %cst [1] : vector<1x8x16xf32> to vector<1x16xf32>
    %c0_3 = arith.constant 0 : index
    %c0_4 = arith.constant 0 : index
    %5 = vector.load %arg6[%c0_3, %c0_4] : memref<1x16xf32, #tpu.memory_space<vmem>>, vector<1x16xf32>
    %6 = arith.maximumf %5, %4 : vector<1x16xf32>
    %c0_5 = arith.constant 0 : index
    %c0_6 = arith.constant 0 : index
    %7 = vector.load %arg6[%c0_5, %c0_6] : memref<1x16xf32, #tpu.memory_space<vmem>>, vector<1x16xf32>
    tpu.vector_store %arg6[%c0_5, %c0_6], %6 {strides = array<i32>} : memref<1x16xf32, #tpu.memory_space<vmem>>, vector<1x16xf32>,
    %c0_i32_7 = arith.constant 0 : i32
    %8 = arith.cmpi eq, %arg1, %c0_i32_7 : i32
    %9 = arith.extui %8 : i1 to i32
    %c0_i32_8 = arith.constant 0 : i32
    %10 = arith.cmpi ne, %9, %c0_i32_8 : i32
    scf.if %10 {
      %c0_9 = arith.constant 0 : index
      %c0_10 = arith.constant 0 : index
      %c0_11 = arith.constant 0 : index
      %11 = vector.load %arg2[%c0_9, %c0_10, %c0_11] : memref<1x1x16xf32, #tpu.memory_space<vmem>>, vector<1x1x16xf32>
      %12 = vector.shape_cast %11 : vector<1x1x16xf32> to vector<1x16xf32>
      %c0_12 = arith.constant 0 : index
      %c0_13 = arith.constant 0 : index
      %c0_14 = arith.constant 0 : index
      %13 = vector.load %arg3[%c0_12, %c0_13, %c0_14] : memref<1x1x16xf32, #tpu.memory_space<vmem>>, vector<1x1x16xf32>
      %14 = vector.shape_cast %13 : vector<1x1x16xf32> to vector<1x16xf32>
      %c0_15 = arith.constant 0 : index
      %c0_16 = arith.constant 0 : index
      %15 = vector.load %arg6[%c0_15, %c0_16] : memref<1x16xf32, #tpu.memory_space<vmem>>, vector<1x16xf32>
      %cst_17 = arith.constant 0.000000e+00 : f32
      %16 = vector.broadcast %cst_17 : f32 to vector<1x16xf32>
      %17 = arith.maximumf %12, %16 : vector<1x16xf32>
      %18 = arith.mulf %12, %14 : vector<1x16xf32>
      %19 = arith.subf %17, %18 : vector<1x16xf32>
      %20 = math.absf %12 : vector<1x16xf32>
      %cst_18 = arith.constant 0.000000e+00 : f32
      %21 = vector.broadcast %cst_18 : f32 to vector<1x16xf32>
      %22 = arith.subf %21, %20 : vector<1x16xf32>
      %23 = math.exp %22 : vector<1x16xf32>
      %24 = math.log1p %23 : vector<1x16xf32>
      %25 = arith.addf %19, %24 : vector<1x16xf32>
      %26 = math.log %15 : vector<1x16xf32>
      %cst_19 = arith.constant -1.000000e+02 : f32
      %27 = vector.broadcast %cst_19 : f32 to vector<1x16xf32>
      %28 = arith.maximumf %26, %27 : vector<1x16xf32>
      %cst_20 = arith.constant 1.000000e+00 : f32
      %29 = vector.broadcast %cst_20 : f32 to vector<1x16xf32>
      %30 = arith.subf %29, %15 : vector<1x16xf32>
      %31 = math.log %30 : vector<1x16xf32>
      %cst_21 = arith.constant -1.000000e+02 : f32
      %32 = vector.broadcast %cst_21 : f32 to vector<1x16xf32>
      %33 = arith.maximumf %31, %32 : vector<1x16xf32>
      %34 = arith.mulf %14, %28 : vector<1x16xf32>
      %cst_22 = arith.constant 1.000000e+00 : f32
      %35 = vector.broadcast %cst_22 : f32 to vector<1x16xf32>
      %36 = arith.subf %35, %14 : vector<1x16xf32>
      %37 = arith.mulf %36, %33 : vector<1x16xf32>
      %38 = arith.addf %34, %37 : vector<1x16xf32>
      %cst_23 = arith.constant 0.000000e+00 : f32
      %39 = vector.broadcast %cst_23 : f32 to vector<1x16xf32>
      %40 = arith.subf %39, %38 : vector<1x16xf32>
      %41 = vector.shape_cast %25 : vector<1x16xf32> to vector<1x1x16xf32>
      %cst_24 = arith.constant dense<0.000000e+00> : vector<1xf32>
      %42 = vector.multi_reduction <add>, %41, %cst_24 [1, 2] : vector<1x1x16xf32> to vector<1xf32>
      %43 = vector.shape_cast %42 : vector<1xf32> to vector<1x1x1xf32>
      %44 = vector.extract %43[0, 0, 0] : f32 from vector<1x1x1xf32>
      %cst_25 = arith.constant 1.000000e+00 : f32
      %45 = arith.mulf %cst_25, %44 : f32
      %46 = vector.shape_cast %40 : vector<1x16xf32> to vector<1x1x16xf32>
      %cst_26 = arith.constant dense<0.000000e+00> : vector<1xf32>
      %47 = vector.multi_reduction <add>, %46, %cst_26 [1, 2] : vector<1x1x16xf32> to vector<1xf32>
      %48 = vector.shape_cast %47 : vector<1xf32> to vector<1x1x1xf32>
      %49 = vector.extract %48[0, 0, 0] : f32 from vector<1x1x1xf32>
      %cst_27 = arith.constant 5.000000e-01 : f32
      %50 = arith.mulf %cst_27, %49 : f32
      %51 = arith.addf %45, %50 : f32
      %52 = vector.broadcast %51 : f32 to vector<1x1x1xf32>
      %c0_28 = arith.constant 0 : index
      %c0_29 = arith.constant 0 : index
      %c0_30 = arith.constant 0 : index
      %53 = vector.load %arg5[%c0_28, %c0_29, %c0_30] : memref<1x1x1xf32, #tpu.memory_space<vmem>>, vector<1x1x1xf32>
      tpu.vector_store %arg5[%c0_28, %c0_29, %c0_30], %52 {strides = array<i32>} : memref<1x1x1xf32, #tpu.memory_space<vmem>>, vector<1x1x1xf32>,
    } else {
    }
    return
  }
  func.func @transform_0(%arg0: i32, %arg1: i32) -> (i32, i32, i32) {
    %c0_i32 = arith.constant 0 : i32
    %c0_i32_0 = arith.constant 0 : i32
    %c0_i32_1 = arith.constant 0 : i32
    return %arg0, %c0_i32, %c0_i32_0 : i32, i32, i32
  }
  func.func @transform_1(%arg0: i32, %arg1: i32) -> (i32, i32, i32) {
    %c0_i32 = arith.constant 0 : i32
    %c0_i32_0 = arith.constant 0 : i32
    %c0_i32_1 = arith.constant 0 : i32
    return %arg0, %c0_i32, %c0_i32_0 : i32, i32, i32
  }
  func.func @transform_2(%arg0: i32, %arg1: i32) -> (i32, i32, i32) {
    %c0_i32 = arith.constant 0 : i32
    %c0_i32_0 = arith.constant 0 : i32
    return %arg0, %arg1, %c0_i32 : i32, i32, i32
  }
  func.func @transform_3(%arg0: i32, %arg1: i32) -> (i32, i32, i32) {
    %c0_i32 = arith.constant 0 : i32
    %c0_i32_0 = arith.constant 0 : i32
    %c0_i32_1 = arith.constant 0 : i32
    return %arg0, %c0_i32, %c0_i32_0 : i32, i32, i32
  }
}

</mosaic_0001>

<bundles_post_ra>
// kernel: tpu_custom_call.1
= control target key start
LH: loop header
LB: loop body
LE: loop exit
PB: predicated region body
PF: predicated region fallthrough
CT: control target
= control target key end

     0   :  { %8 = vsyncpa [#allocation4], 0  ;;  %s823_s0 = inlined_call_operand.hbm [shape: f32[2,1,16], index: 0, kind: input, shape index: {}]   ;;  %s824_s1 = inlined_call_operand.vmem [shape: f32[2,1,16], index: 1, kind: input, shape index: {}]   ;;  %s825_s2 = inlined_call_operand.hbm [shape: f32[2,8,16], index: 2, kind: input, shape index: {}]   ;;  %s826_s3 = inlined_call_operand.vmem [shape: f32[2,1,1], index: 3, kind: output, shape index: {}]  }
   0x1   :  { %10 = vsyncpa [#allocation4 + $0x1], 0 }
   0x2   :  { %11 = vsyncpa [#allocation6], 0 }
   0x3   :  { %13 = vsyncpa [#allocation6 + $0x1], 0  ;;  %s646_s12 = smov 0   ;;  %s648_s13 = smov 0  }
   0x4   :  { %s650_s14 = smov 0   ;;  %s652_s15 = smov 0  }
   0x5   :  { %s654_s16 = smov 0   ;;  %s656_s17 = smov 0  }
   0x6 LB: > { %s423_s18 = sadd.s32 4294967295, %s621_s17   ;;  %s31_s19 = sadd.s32 1, %s617_s16  ;;  %s621_s17 = sphi %s656_s17, %s19_s17   ;;  %s617_s16 = sphi %s654_s16, %s840_s16   ;;  %s613_s15 = sphi %s652_s15, %s839_s15   ;;  %s609_s14 = sphi %s650_s14, %s838_s14   ;;  %s605_s13 = sphi %s648_s13, %s837_s13   ;;  %s601_s12 = sphi %s646_s12, %s836_s12  }
   0x7   : > { %p33_p0 = scmp.ge.s32.totalorder %s31_s19, 2  ;;  %s38_s20 = sadd.s32 1, %s609_s14 }
   0x8   : > { %p45_p1 = scmp.ne.s32.totalorder %s609_s14, %s605_s13  ;;  %p46_p2 = scmp.eq.s32.totalorder %s621_s17, 0 }
   0x9   : > { %s842_s19 = smov (%p33_p0, %s31_s19), 0  ;;  %p51_p4 = scmp.ne.s32.totalorder %s605_s13, %s601_s12 }
   0xa   : > { %p682_p3 = por %p46_p2, %p45_p1  ;;  %s35_s22 = ssub.s32 %s617_s16, %s842_s19 }
   0xb   : > { %p52_p5 = scmp.eq.s32.totalorder %s423_s18, 0  ;;  %p36_p6 = scmp.eq.s32.totalorder %s35_s22, 0 }
   0xc   : > { %p449_p8 = scmp.lt.s32.totalorder %s621_s17, 2  ;;  %s698_s25 = sand.u32 1, %s609_s14  }
   0xd   : > { %p689_p7 = por %p52_p5, %p51_p4  ;;  %s427_s26 = sshll.u32 %s617_s16, 4 }
   0xe   : > { %s695_s24 = scalar_select %p36_p6, %s609_s14, %s38_s20  }
   0xf   : > { %s829_s23 = scalar_select %p689_p7, 1, 0 }
  0x10   : > { %s704_s29 = scalar_lea.hbm %s823_s0, %s427_s26  ;;  %s158_s30 = scalar_lea.vmem [#allocation3], %s698_s25 }
  0x11   : > { %s165_s4 = sshll.u32 %s158_s30, 4  ;;  %p711_p9 = pnand %p449_p8, %p682_p3  ;;  %s707_s4 = int_to_ptr.vmem [resolvable:$true] %s165_s4 }
  0x12   : > { %s156_s6 = scalar_lea.sflag [#allocation4], %s698_s25  ;;  %s507_s7 = scalar_lea.hbm %s704_s29, 16 }
  0x13   : > { %p508_p12 = scmp.ne.s32.totalorder %s704_s29, %s507_s7  ;;  %p509_p13 = pneg %p711_p9 }
  0x14   : > { %s512_s10 = scalar_lea.hbm %s823_s0, 32  ;;  %p513_p2 = scmp.lt.u32.totalorder %s704_s29, %s823_s0 }
  0x15   : > { %p510_p0 = pnand %p509_p13, %p508_p12  ;;  %p514_p3 = scmp.lt.u32.totalorder %s512_s10, %s507_s7 }
  0x16   : > { %p516_p5 = scmp.lt.u32.totalorder %s507_s7, %s704_s29 }
  0x17   : > { %p511_p1 = pneg %p510_p0  ;;  %p515_p4 = por %p514_p3, %p513_p2 }
  0x19   : > { %p517_p6 = por %p516_p5, %p515_p4 }
  0x1b   : > { %p518_p8 = pnand %p517_p6, %p511_p1 }
  0x1d   : > { %521 = shalt.err (!%p518_p8)
}
  0x1e   : > { %s522_s18 = scalar_lea.vmem %s707_s4, 16  ;;  %s623_s20 = smov [#allocation3]  }
  0x1f   : > { %p523_p12 = scmp.ne.s32.totalorder %s707_s4, %s522_s18  ;;  %s527_s21 = sshll.u32 %s623_s20, 4  ;;  %s528_s21 = int_to_ptr.vmem [resolvable:$false] %s527_s21 }
  0x20   : > { %s529_s22 = scalar_lea.vmem %s528_s21, 32  ;;  %p530_p11 = scmp.lt.s32.totalorder %s707_s4, %s528_s21 }
  0x21   : > { %p525_p0 = pnand %p523_p12, %p509_p13  ;;  %p531_p2 = scmp.lt.s32.totalorder %s529_s22, %s522_s18 }
  0x23   : > { %p526_p10 = pneg %p525_p0  ;;  %p532_p3 = por %p531_p2, %p530_p11 }
  0x25   : > { %p533_p4 = pnand %p532_p3, %p526_p10 }
  0x27   : > { %536 = shalt.err (!%p533_p4)
}
  0x28   : > { %445 = dma.hbm_to_vmem [thread:$0]  (!%p711_p9), %s704_s29, 16, %s707_s4, %s156_s6  }
  0x29   : > { %p831_p1 = scmp.lt.s32.totalorder %s621_s17, 3  ;;  %p832_p5 = scmp.ge.s32.totalorder %s621_s17, 1 }
  0x2a   : > { %s428_s27 = sshll.u32 %s698_s25, 3  ;;  %s429_s28 = sshll.u32 %s617_s16, 7 }
  0x2b   : > { %p747_p6 = pnand %p832_p5, %p831_p1  ;;  %s756_s8 = scalar_lea.hbm %s825_s2, %s429_s28 }
  0x2c   : > { %s182_s9 = scalar_lea.vmem [#allocation5], %s428_s27  ;;  %s179_s29 = scalar_lea.sflag [#allocation6], %s698_s25 }
  0x2d   : > { %s833_s26 = scalar_select %p747_p6, 1, 0 }
  0x2e   : > { %s190_s10 = sshll.u32 %s182_s9, 4  ;;  %s537_s4 = scalar_lea.hbm %s756_s8, 128  ;;  %s191_s10 = int_to_ptr.vmem [resolvable:$true] %s190_s10 }
  0x2f   : > { %p538_p10 = scmp.ne.s32.totalorder %s756_s8, %s537_s4  ;;  %s542_s12 = scalar_lea.hbm %s825_s2, 256 }
  0x30   : > { %p543_p12 = scmp.lt.u32.totalorder %s756_s8, %s825_s2  ;;  %p544_p0 = scmp.lt.u32.totalorder %s542_s12, %s537_s4 }
  0x31   : > { %p540_p11 = pnand %p538_p10, %p509_p13  ;;  %p546_p3 = scmp.lt.u32.totalorder %s537_s4, %s756_s8 }
  0x32   : > { %p545_p2 = por %p544_p0, %p543_p12 }
  0x33   : > { %p541_p8 = pneg %p540_p11 }
  0x34   : > { %p547_p4 = por %p546_p3, %p545_p2 }
  0x36   : > { %p548_p1 = pnand %p547_p4, %p541_p8 }
  0x38   : > { %551 = shalt.err (!%p548_p1)
}
  0x39   : > { %s552_s25 = scalar_lea.vmem %s191_s10, 128  ;;  %s624_s21 = smov [#allocation5]  }
  0x3a   : > { %p553_p5 = scmp.ne.s32.totalorder %s191_s10, %s552_s25  ;;  %s557_s22 = sshll.u32 %s624_s21, 4  ;;  %s558_s22 = int_to_ptr.vmem [resolvable:$false] %s557_s22 }
  0x3b   : > { %s559_s27 = scalar_lea.vmem %s558_s22, 256  ;;  %p560_p7 = scmp.lt.s32.totalorder %s191_s10, %s558_s22 }
  0x3c   : > { %p555_p10 = pnand %p553_p5, %p509_p13  ;;  %p561_p6 = scmp.lt.s32.totalorder %s559_s27, %s552_s25 }
  0x3e   : > { %p556_p11 = pneg %p555_p10  ;;  %p562_p0 = por %p561_p6, %p560_p7 }
  0x40   : > { %p563_p12 = pnand %p562_p0, %p556_p11 }
  0x42   : > { %566 = shalt.err (!%p563_p12)
}
  0x43   : > { %448 = dma.hbm_to_vmem [thread:$0]  (!%p711_p9), %s756_s8, 128, %s191_s10, %s179_s29  }
  0x44   : > { %p834_p8 = scmp.ne.s32.totalorder %s833_s26, 0 }
  0x45   : > { %s201_s28 = sand.u32 (!%p834_p8), 1, %s605_s13   ;;  %p835_p13 = scmp.ne.s32.totalorder (!%p834_p8), %s829_s23, 0 }
  0x46   : > { %199 = sbr.rel (%p834_p8) target bundleno = 340 (0x154), region = 32  ;;  %s202_s30 = scalar_lea.sflag (!%p834_p8), [#allocation4], %s201_s28 }
  0x47   : > { %s204_s7 = scalar_lea.vmem (!%p834_p8), [#allocation3], %s201_s28 }
  0x4d   : > { %592 = dma.done.wait (%p835_p13), %s202_s30, 16  }
  0x4e   : > { %594 = vsyncadd (%p835_p13), %s202_s30, 4294967280  ;;  %s431_s9 = sshll.u32 %s201_s28, 3  ;;  %s210_s4 = scalar_lea.sflag [#allocation6], %s201_s28 }
  0x4f   : > { %s213_s6 = scalar_lea.vmem [#allocation5], %s431_s9 }
  0x50   : > { %596 = dma.done.wait (%p835_p13), %s210_s4, 128  }
  0x51   : > { %598 = vsyncadd (%p835_p13), %s210_s4, 4294967168  ;;  %vm251_vm0 = vcmask 122880   ;;  %v625_v0 = vmov -inf   ;;  %vm254_vm1 = vcmask 130048   ;;  %v269_v1 = vld [vmem:[%s204_s7] sm:$0x1] }
  0x52   : > { %252 = vst.msk [vmem:[#allocation2] sm:$0x1] %vm251_vm0, %v625_v0  ;;  %v253_v2 = vld [vmem:[%s213_s6] sm:$0xff]  ;;  %v275_v3 = vand.u32 2147483647, %v269_v1  ;;  %p241_p7 = scmp.lt.s32.totalorder %s613_s15, 1 }
  0x53   : > { %v255_v4 = vsel %vm254_vm1, %v253_v2, -inf  ;;  %v272_v22 = vmax.f32 %v269_v1, 0.0  ;;  %vm324_vm3 = vcmask 0  }
  0x54   : > { %v256_v5 = vrot.slane %v255_v4, 4  ;;  %v276_v6 = vsub.f32 0.0, %v275_v3  ;;  %s844_s15 = smov (!%p241_p7, %s613_s15), 1 }
  0x55   : > { %s243_s26 = scalar_lea.vmem %s824_s1, %s844_s15  ;;  %s246_s18 = scalar_lea.vmem %s826_s3, %s844_s15 }
  0x56   : > { %v257_v7 = vmax.f32 %v255_v4, %v256_v5  ;;  %v277_v8 = vmul.f32 1.442695, %v276_v6  ;;  %v270_v18 = vld [vmem:[%s243_s26] sm:$0x1] }
  0x57   : > { %v273_v23 = vmul.f32 %v270_v18, %v269_v1  ;;  %v297_v37 = vsub.f32 1.0, %v270_v18 }
  0x58   : > { %v258_v9 = vrot.slane %v257_v7, 2  ;;  %499 = vpow2.f32 %v277_v8 }
  0x59   : > { %v262_v12 = vld [vmem:[#allocation2] sm:$0x1]  ;;  %v274_v27 = vsub.f32 %v272_v22, %v273_v23 }
  0x5a   : > { %v259_v10 = vmax.f32 %v257_v7, %v258_v9 }
  0x5c   : > { %v260_v11 = vrot.slane %v259_v10, 1 }
  0x5e   : > { %v261_v13 = vmax.f32 %v259_v10, %v260_v11 }
  0x60   : > { %v263_v14 = vmax.f32 %v262_v12, %v261_v13 }
  0x62   : > { %265 = vst.msk [vmem:[#allocation2] sm:$0x1] %vm251_vm0, %v263_v14  ;;  %v500_v15 = vpop.eup %499 }
  0x63   : > { %v279_v16 = vadd.f32 1.0, %v500_v15  ;;  %v282_v17 = vmul.f32 -0.5, %v500_v15  ;;  %v285_v24 = vand.u32 2147483647, %v500_v15 }
  0x65   : > { %501 = vlog2.f32 %v279_v16  ;;  %v283_v21 = vadd.f32 1.0, %v282_v17  ;;  %vm286_vm2 = vcmp.lt.f32.partialorder %v285_v24, 0.0004427343 }
  0x67   : > { %v284_v25 = vmul.f32 %v500_v15, %v283_v21 }
  0x69   : > { %v271_v19 = vld [vmem:[#allocation2] sm:$0x1] }
  0x6a   : > { %503 = vlog2.f32 %v271_v19  ;;  %v292_v20 = vsub.f32 1.0, %v271_v19 }
  0x6c   : > { %505 = vlog2.f32 %v292_v20 }
  0x6f   : > { %v502_v26 = vpop.eup %501 }
  0x70   : > { %v281_v28 = vmul.f32 0.6931472, %v502_v26 }
  0x72   : > { %v287_v29 = vsel %vm286_vm2, %v284_v25, %v281_v28 }
  0x73   : > { %v288_v31 = vadd.f32 %v287_v29, %v274_v27 }
  0x74   : > { %v504_v30 = vpop.eup %503 }
  0x75   : > { %v290_v32 = vmul.f32 0.6931472, %v504_v30  ;;  %v301_v34 = vsel %vm251_vm0, %v288_v31, 0.0 }
  0x76   : > { %v506_v33 = vpop.eup %505  ;;  %302 = vadd.xlane.f32.xlu0 %v301_v34 }
  0x77   : > { %v291_v35 = vmax.f32 %v290_v32, -100.0  ;;  %v294_v36 = vmul.f32 0.6931472, %v506_v33 }
  0x79   : > { %v295_v38 = vmax.f32 %v294_v36, -100.0  ;;  %v296_v39 = vmul.f32 %v291_v35, %v270_v18 }
  0x7b   : > { %v298_v40 = vmul.f32 %v297_v37, %v295_v38 }
  0x7d   : > { %v299_v41 = vadd.f32 %v298_v40, %v296_v39 }
  0x7f   : > { %v300_v42 = vsub.f32 0.0, %v299_v41 }
  0x81   : > { %v311_v43 = vsel %vm251_vm0, %v300_v42, 0.0 }
  0x82   : > { %312 = vadd.xlane.f32.xlu0 %v311_v43 }
 0x103   : > { %v303_v44 = vpop.xlane.xlu0 %302 }
 0x104   : > { %v304_v45 = vrot.slane %v303_v44, 4 }
 0x106   : > { %v305_v46 = vadd.f32 %v304_v45, %v303_v44 }
 0x108   : > { %v306_v47 = vrot.slane %v305_v46, 2 }
 0x10a   : > { %v307_v48 = vadd.f32 %v306_v47, %v305_v46 }
 0x10c   : > { %v308_v49 = vrot.slane %v307_v48, 1 }
 0x10e   : > { %v309_v51 = vadd.f32 %v308_v49, %v307_v48 }
 0x10f   : > { %v313_v50 = vpop.xlane.xlu0 %312 }
 0x110   : > { %v314_v52 = vrot.slane %v313_v50, 4  ;;  %434 = vpush %v309_v51 }
 0x112   : > { %v315_v53 = vadd.f32 %v314_v52, %v313_v50 }
 0x114   : > { %v316_v54 = vrot.slane %v315_v53, 2 }
 0x116   : > { %v317_v55 = vadd.f32 %v316_v54, %v315_v53 }
 0x118   : > { %v318_v56 = vrot.slane %v317_v55, 1 }
 0x11a   : > { %v319_v57 = vadd.f32 %v318_v56, %v317_v55 }
 0x11c   : > { %436 = vpush %v319_v57 }
 0x141   : > { %s435_s8 = spop %434 }
 0x14d   : > { %s437_s10 = spop %436 }
 0x14e   : > { %s321_s29 = smul.f32 0.5, %s437_s10 }
 0x150   : > { %s322_s20 = sadd.f32 %s435_s8, %s321_s29 }
 0x152   : > { %v323_v58 = vstv %s322_s20 }
 0x153   : > { %325 = vst.msk [vmem:[%s246_s18] sm:$0x1] %vm324_vm3, %v323_v58 }
 0x154 PF: > { %s19_s17 = sadd.s32 1, %s621_s17   ;;  %s836_s12 = smov %s605_s13 }
 0x155   : > { %p16_p9 = scmp.ge.s32.totalorder %s19_s17, 4   ;;  %s837_s13 = smov %s609_s14 }
 0x156   : > { %s838_s14 = smov %s695_s24  ;;  %s839_s15 = smov %s617_s16 }
 0x157   : > { %s840_s16 = smov %s842_s19  ;;  %18 = sbr.rel (!%p16_p9) target bundleno = 6 (0x6), region = 96 }
 0x15e   :  { %343 = vsyncpa [#allocation4], 1 }
 0x15f   :  { %345 = vsyncpa [#allocation4 + $0x1], 1 }
 0x160   :  { %346 = vsyncpa [#allocation6], 1 }
 0x161   :  { %348 = vsyncpa [#allocation6 + $0x1], 1 }

</bundles_post_ra>
